<compile_context>
chip_gen: v5e
topology: v5e:2x2
jax: 0.10.0
libtpu: 0.0.40
codegen_flags: <defaults>
</compile_context>

<pallas_src>
import functools
import inspect

import jax
import jax.numpy as jnp
from jax.experimental import pallas as pl
from jax.experimental.pallas import tpu as pltpu

_LANE = 128          # TPU lane width
_ROW_ALIGN = 16      # multiple of 8 (f32 sublanes) and 16 (bf16 packing)
_MAX_TILE_ROWS = 2048


def _round_up(x, m):
    return (x + m - 1) // m * m


def _supports_single_buffer():
    if not hasattr(pl, "Buffered"):
        return False
    try:
        return "pipeline_mode" in inspect.signature(pl.BlockSpec).parameters
    except (TypeError, ValueError):
        return False


_SINGLE_BUFFER_WEIGHTS = _supports_single_buffer()


def _resident_spec(block_shape):
    """BlockSpec for grid-invariant (resident) operands: constant index_map,
    single-buffered when supported (halves resident-weight VMEM)."""
    if _SINGLE_BUFFER_WEIGHTS:
        return pl.BlockSpec(block_shape, lambda i: (0, 0),
                            pipeline_mode=pl.Buffered(1))
    return pl.BlockSpec(block_shape, lambda i: (0, 0))


def _vmem_capacity_bytes():
    try:
        info = pltpu.get_tpu_info()
        cap = getattr(info, "vmem_capacity_bytes", None)
        if cap:
            return int(cap)
    except Exception:
        pass
    return 64 * 1024 * 1024  # conservative: v7x has 64 MiB per TensorCore


# ----------------------------- kernels --------------------------------------


def _adapter_core(x, wd_ref, bd_ref, wu_ref, bu_ref):
    """up = (ReLU(x @ Wd^T + bd)) @ Wu^T + bu, f32 MXU accumulation."""
    # Cast to the weight/compute dtype right before the MXU: an in-kernel cast
    # is free compared with a wrapper-side HBM pass over the activations.
    down = jnp.dot(x.astype(wd_ref.dtype), wd_ref[...],
                   preferred_element_type=jnp.float32)
    down = jnp.maximum(down + bd_ref[...].astype(jnp.float32), 0.0)
    # TODO(synk): dropout with p > 0 (training mode) would need pltpu PRNG; the
    # module default p = 0.0 is an identity, so it is omitted here.
    up = jnp.dot(down.astype(wu_ref.dtype), wu_ref[...],
                 preferred_element_type=jnp.float32)
    return up + bu_ref[...].astype(jnp.float32)


def _adapter_kernel(x_ref, ox_ref, wd_ref, bd_ref, wu_ref, bu_ref, out_ref, *, scale):
    x = x_ref[...]
    up = _adapter_core(x, wd_ref, bd_ref, wu_ref, bu_ref)
    # Residual add + scale in f32 (v5e VPU has no bf16 elementwise path).
    out = ox_ref[...].astype(jnp.float32) + up * scale
    out_ref[...] = out.astype(out_ref.dtype)


def _adapter_kernel_shared(x_ref, wd_ref, bd_ref, wu_ref, bu_ref, out_ref, *, scale):
    # Fast path: the residual o_x is the same tensor as x -> one HBM stream fewer.
    x = x_ref[...]
    up = _adapter_core(x, wd_ref, bd_ref, wu_ref, bu_ref)
    out = x.astype(jnp.float32) + up * scale
    out_ref[...] = out.astype(out_ref.dtype)


# ----------------------------- host wrappers ---------------------------------


def prepare_adapter_params(wd, bd, wu, bu, *, compute_dtype=None):
    """One-time weight layout prep (hoisted out of the per-call path).

    wd: (mid_dim, in_dim), bd: (mid_dim,), wu: (in_dim, mid_dim), bu: (in_dim,)
    Transposes and zero-pads to lane multiples (numerically exact: padded mid
    units get bias 0 -> ReLU -> 0; padded in_dim columns of Wu^T / bu are 0).
    `compute_dtype` only affects the weights — activations are streamed in
    their own dtype and cast in-kernel.
    """
    mid_dim, in_dim = wd.shape
    cdt = jnp.dtype(compute_dtype) if compute_dtype is not None else jnp.dtype(wd.dtype)
    in_dim_p = _round_up(in_dim, _LANE)
    mid_dim_p = _round_up(mid_dim, _LANE)

    wd_t = jnp.pad(wd.T.astype(cdt), ((0, in_dim_p - in_dim), (0, mid_dim_p - mid_dim)))
    wu_t = jnp.pad(wu.T.astype(cdt), ((0, mid_dim_p - mid_dim), (0, in_dim_p - in_dim)))
    bd_p = jnp.pad(bd.astype(cdt), (0, mid_dim_p - mid_dim)).reshape(1, mid_dim_p)
    bu_p = jnp.pad(bu.astype(cdt), (0, in_dim_p - in_dim)).reshape(1, in_dim_p)

    return {
        "wd_t": wd_t, "bd": bd_p, "wu_t": wu_t, "bu": bu_p,
        "in_dim": in_dim, "mid_dim": mid_dim,
        "in_dim_p": in_dim_p, "mid_dim_p": mid_dim_p,
        "compute_dtype": cdt,
    }


def adapter_forward(x, o_x, params, *, scale=0.1, tile_rows=None, out_dtype=None):
    """x, o_x: (N, in_dim). `params` from prepare_adapter_params.

    out = o_x + (ReLU(x @ Wd^T + bd) @ Wu^T + bu) * scale
    `scale` is the non-learnable scalar s (learnable_scalar=True would pass a
    scalar value here; it is folded as a compile-time constant).
    """
    N, in_dim = x.shape
    assert in_dim == params["in_dim"], "in_dim mismatch with prepared params"
    in_dim_p, mid_dim_p = params["in_dim_p"], params["mid_dim_p"]
    out_dtype = jnp.dtype(out_dtype) if out_dtype is not None else jnp.dtype(x.dtype)
    shared = o_x is x
    pad_cols = in_dim_p != in_dim

    if pad_cols:
        # Rare path (in_dim not a multiple of 128): column-pad only; no row
        # padding and no dtype cast.  Zero padding is numerically exact.
        x_in = jnp.pad(x, ((0, 0), (0, in_dim_p - in_dim)))
        ox_in = x_in if shared else jnp.pad(o_x, ((0, 0), (0, in_dim_p - in_dim)))
    else:
        # Fast path (CLIP hidden sizes 768/1024): stream straight from HBM.
        x_in, ox_in = x, o_x
    cols = in_dim_p

    # --- VMEM footprint & row-tile derivation -------------------------------
    x_isz = jnp.dtype(x.dtype).itemsize
    ox_isz = jnp.dtype(o_x.dtype).itemsize
    out_isz = out_dtype.itemsize
    w_isz = jnp.dtype(params["wd_t"].dtype).itemsize
    w_bufs = 1 if _SINGLE_BUFFER_WEIGHTS else 2

    # Double-buffered activation/output streams + f32 intermediates (per live
    # row) ... resident weights + sublane-padded biases (fixed).
    per_row = ((2 * x_isz + (0 if shared else 2 * ox_isz) + 2 * out_isz) * cols
               + 4 * mid_dim_p + 4 * cols)
    fixed = (w_bufs * 2 * in_dim_p * mid_dim_p * w_isz
             + w_bufs * 8 * (mid_dim_p + in_dim_p) * w_isz)

    cap = _vmem_capacity_bytes()
    budget = int(cap * 0.75) - (2 << 20)  # headroom for Mosaic internal scratch

    if tile_rows is not None:
        tm = int(tile_rows)
    else:
        tm = (budget - fixed) // max(per_row, 1)
        tm = min(tm, _MAX_TILE_ROWS)
    tm = max(_ROW_ALIGN, (tm // _ROW_ALIGN) * _ROW_ALIGN)
    tm = min(tm, _round_up(N, _ROW_ALIGN))  # never allocate more rows than needed
    # Keep >= 2 grid steps for non-tiny N: pipeline overlap + both v7x TensorCores.
    if N > 2 * _ROW_ALIGN and pl.cdiv(N, tm) < 2:
        tm = max(_ROW_ALIGN, _round_up(pl.cdiv(N, 2), _ROW_ALIGN))

    grid = (pl.cdiv(N, tm),)
    footprint = fixed + tm * per_row
    vmem_limit = int(min(cap * 0.8, max(32 << 20, footprint * 1.3 + (2 << 20))))

    # --- specs ----------------------------------------------------------------
    row_spec = pl.BlockSpec((tm, cols), lambda i: (i, 0))
    weight_specs = [
        _resident_spec((in_dim_p, mid_dim_p)),  # Wd^T (resident)
        _resident_spec((1, mid_dim_p)),         # bd
        _resident_spec((mid_dim_p, in_dim_p)),  # Wu^T (resident)
        _resident_spec((1, in_dim_p)),          # bu
    ]

    if shared:
        kernel = functools.partial(_adapter_kernel_shared, scale=float(scale))
        in_specs = [row_spec] + weight_specs
        operands = (x_in, params["wd_t"], params["bd"], params["wu_t"], params["bu"])
    else:
        kernel = functools.partial(_adapter_kernel, scale=float(scale))
        in_specs = [row_spec, row_spec] + weight_specs
        operands = (x_in, ox_in, params["wd_t"], params["bd"],
                    params["wu_t"], params["bu"])

    out = pl.pallas_call(
        kernel,
        out_shape=jax.ShapeDtypeStruct((N, cols), out_dtype),
        grid_spec=pltpu.PrefetchScalarGridSpec(
            num_scalar_prefetch=0,
            grid=grid,
            in_specs=in_specs,
            out_specs=pl.BlockSpec((tm, cols), lambda i: (i, 0)),
        ),
        compiler_params=pltpu.CompilerParams(
            dimension_semantics=("parallel",),
            vmem_limit_bytes=vmem_limit,
        ),
    )(*operands)

    return out[:, :in_dim] if pad_cols else out


def adapter_reference(x, o_x, wd, bd, wu, bu, scale=0.1):
    down = jnp.maximum(x @ wd.T + bd, 0.0)
    up = down @ wu.T + bu
    return o_x + up * scale


if __name__ == "__main__":
    key = jax.random.PRNGKey(0)
    k_x, k_ox, k_wd, k_bd, k_wu, k_bu, k_x2, k_ox2 = jax.random.split(key, 8)
    scale = 0.1

    # ---- Test 1: small non-lane-aligned dims (column-pad path), f32 exact. ----
    batch, seq, in_dim, mid_dim = 2, 8, 32, 8
    N = batch * seq
    x = jax.random.normal(k_x, (N, in_dim), dtype=jnp.float32)
    o_x = jax.random.normal(k_ox, (N, in_dim), dtype=jnp.float32)
    # nn.Linear-shaped params.  (PyTorch init zeroes up_proj & biases; we use
    # nonzero deterministic values so the check against the reference is non-trivial.)
    wd = jax.random.normal(k_wd, (mid_dim, in_dim), dtype=jnp.float32) * 0.1
    bd = jax.random.normal(k_bd, (mid_dim,), dtype=jnp.float32) * 0.01
    wu = jax.random.normal(k_wu, (in_dim, mid_dim), dtype=jnp.float32) * 0.1
    bu = jax.random.normal(k_bu, (in_dim,), dtype=jnp.float32) * 0.01

    params = prepare_adapter_params(wd, bd, wu, bu)
    out = jax.block_until_ready(adapter_forward(x, o_x, params, scale=scale))
    ref = adapter_reference(x, o_x, wd, bd, wu, bu, scale=scale)
    assert out.shape == (N, in_dim)
    assert jnp.allclose(out, ref, atol=1e-5, rtol=1e-5), "test1 f32 mismatch"

    # ---- Test 2: lane-aligned fast path (no wrapper pad/cast/slice), ragged N. --
    in_dim2, mid_dim2, N2 = 128, 64, 48   # 48 rows -> 2 grid steps, masked last block
    x2 = jax.random.normal(k_x2, (N2, in_dim2), dtype=jnp.float32)
    ox2 = jax.random.normal(k_ox2, (N2, in_dim2), dtype=jnp.float32)
    wd2 = jax.random.normal(k_wd, (mid_dim2, in_dim2), dtype=jnp.float32) * 0.1
    bd2 = jax.random.normal(k_bd, (mid_dim2,), dtype=jnp.float32) * 0.01
    wu2 = jax.random.normal(k_wu, (in_dim2, mid_dim2), dtype=jnp.float32) * 0.1
    bu2 = jax.random.normal(k_bu, (in_dim2,), dtype=jnp.float32) * 0.01

    params2 = prepare_adapter_params(wd2, bd2, wu2, bu2)
    out2 = jax.block_until_ready(adapter_forward(x2, ox2, params2, scale=scale))
    ref2 = adapter_reference(x2, ox2, wd2, bd2, wu2, bu2, scale=scale)
    assert out2.shape == (N2, in_dim2)
    assert jnp.allclose(out2, ref2, atol=1e-5, rtol=1e-5), "test2 f32 mismatch"

    # ---- Test 3: shared residual (o_x is x) + bf16 weights, f32 activations. ----
    params_bf16 = prepare_adapter_params(wd2, bd2, wu2, bu2,
                                         compute_dtype=jnp.bfloat16)
    out3 = jax.block_until_ready(adapter_forward(x2, x2, params_bf16, scale=scale))
    ref3 = adapter_reference(x2, x2, wd2, bd2, wu2, bu2, scale=scale)
    assert out3.shape == (N2, in_dim2)
    assert jnp.allclose(out3, ref3, atol=3e-2, rtol=3e-2), "test3 bf16 mismatch"

    print("KERNEL_OK")
</pallas_src>

<mosaic_0001>
module attributes {stable_mosaic.version = 11 : i64} {
  func.func @_adapter_kernel(%arg0: i32, %arg1: memref<16x128xf32, #tpu.memory_space<vmem>>, %arg2: memref<16x128xf32, #tpu.memory_space<vmem>>, %arg3: memref<128x128xf32, #tpu.memory_space<vmem>>, %arg4: memref<1x128xf32, #tpu.memory_space<vmem>>, %arg5: memref<128x128xf32, #tpu.memory_space<vmem>>, %arg6: memref<1x128xf32, #tpu.memory_space<vmem>>, %arg7: memref<16x128xf32, #tpu.memory_space<vmem>>) attributes {dimension_semantics = [#tpu.dimension_semantics<parallel>], iteration_bounds = array<i64: 1>, scalar_prefetch = 0 : i64, scratch_operands = 0 : i64, tpu.core_type = #tpu.core_type<tc>, window_params = [{transform_indices = @transform_0, window_bounds = array<i64: 16, 128>}, {transform_indices = @transform_1, window_bounds = array<i64: 16, 128>}, {pipeline_mode = #tpu.pipeline_mode<synchronous>, transform_indices = @transform_2, window_bounds = array<i64: 128, 128>}, {pipeline_mode = #tpu.pipeline_mode<synchronous>, transform_indices = @transform_3, window_bounds = array<i64: 1, 128>}, {pipeline_mode = #tpu.pipeline_mode<synchronous>, transform_indices = @transform_4, window_bounds = array<i64: 128, 128>}, {pipeline_mode = #tpu.pipeline_mode<synchronous>, transform_indices = @transform_5, window_bounds = array<i64: 1, 128>}, {transform_indices = @transform_6, window_bounds = array<i64: 16, 128>}]} {
    %c0 = arith.constant 0 : index
    %c0_0 = arith.constant 0 : index
    %0 = vector.load %arg1[%c0, %c0_0] : memref<16x128xf32, #tpu.memory_space<vmem>>, vector<16x128xf32>
    %c0_1 = arith.constant 0 : index
    %c0_2 = arith.constant 0 : index
    %1 = vector.load %arg3[%c0_1, %c0_2] : memref<128x128xf32, #tpu.memory_space<vmem>>, vector<128x128xf32>
    %cst = arith.constant dense<0.000000e+00> : vector<16x128xf32>
    %2 = tpu.matmul %0, %1, %cst {dimension_numbers = #tpu.dot_dimension_numbers<[1], [0], [0], [1], [0, 0, 1, 1], [], []>} : vector<16x128xf32>, vector<128x128xf32>, vector<16x128xf32> -> vector<16x128xf32>
    %c0_3 = arith.constant 0 : index
    %c0_4 = arith.constant 0 : index
    %3 = vector.load %arg4[%c0_3, %c0_4] : memref<1x128xf32, #tpu.memory_space<vmem>>, vector<1x128xf32>
    %4 = vector.broadcast %3 : vector<1x128xf32> to vector<16x128xf32>
    %5 = arith.addf %2, %4 : vector<16x128xf32>
    %cst_5 = arith.constant 0.000000e+00 : f32
    %6 = vector.broadcast %cst_5 : f32 to vector<16x128xf32>
    %7 = arith.maximumf %5, %6 : vector<16x128xf32>
    %c0_6 = arith.constant 0 : index
    %c0_7 = arith.constant 0 : index
    %8 = vector.load %arg5[%c0_6, %c0_7] : memref<128x128xf32, #tpu.memory_space<vmem>>, vector<128x128xf32>
    %cst_8 = arith.constant dense<0.000000e+00> : vector<16x128xf32>
    %9 = tpu.matmul %7, %8, %cst_8 {dimension_numbers = #tpu.dot_dimension_numbers<[1], [0], [0], [1], [0, 0, 1, 1], [], []>} : vector<16x128xf32>, vector<128x128xf32>, vector<16x128xf32> -> vector<16x128xf32>
    %c0_9 = arith.constant 0 : index
    %c0_10 = arith.constant 0 : index
    %10 = vector.load %arg6[%c0_9, %c0_10] : memref<1x128xf32, #tpu.memory_space<vmem>>, vector<1x128xf32>
    %11 = vector.broadcast %10 : vector<1x128xf32> to vector<16x128xf32>
    %12 = arith.addf %9, %11 : vector<16x128xf32>
    %c0_11 = arith.constant 0 : index
    %c0_12 = arith.constant 0 : index
    %13 = vector.load %arg2[%c0_11, %c0_12] : memref<16x128xf32, #tpu.memory_space<vmem>>, vector<16x128xf32>
    %cst_13 = arith.constant 1.000000e-01 : f32
    %14 = vector.broadcast %cst_13 : f32 to vector<16x128xf32>
    %15 = arith.mulf %12, %14 : vector<16x128xf32>
    %16 = arith.addf %13, %15 : vector<16x128xf32>
    %c0_14 = arith.constant 0 : index
    %c0_15 = arith.constant 0 : index
    %17 = vector.load %arg7[%c0_14, %c0_15] : memref<16x128xf32, #tpu.memory_space<vmem>>, vector<16x128xf32>
    tpu.vector_store %arg7[%c0_14, %c0_15], %16 {strides = array<i32>} : memref<16x128xf32, #tpu.memory_space<vmem>>, vector<16x128xf32>,
    return
  }
  func.func @transform_0(%arg0: i32) -> (i32, i32) {
    %c0_i32 = arith.constant 0 : i32
    %c0_i32_0 = arith.constant 0 : i32
    return %arg0, %c0_i32 : i32, i32
  }
  func.func @transform_1(%arg0: i32) -> (i32, i32) {
    %c0_i32 = arith.constant 0 : i32
    %c0_i32_0 = arith.constant 0 : i32
    return %arg0, %c0_i32 : i32, i32
  }
  func.func @transform_2(%arg0: i32) -> (i32, i32) {
    %c0_i32 = arith.constant 0 : i32
    %c0_i32_0 = arith.constant 0 : i32
    %c0_i32_1 = arith.constant 0 : i32
    return %c0_i32, %c0_i32_0 : i32, i32
  }
  func.func @transform_3(%arg0: i32) -> (i32, i32) {
    %c0_i32 = arith.constant 0 : i32
    %c0_i32_0 = arith.constant 0 : i32
    %c0_i32_1 = arith.constant 0 : i32
    return %c0_i32, %c0_i32_0 : i32, i32
  }
  func.func @transform_4(%arg0: i32) -> (i32, i32) {
    %c0_i32 = arith.constant 0 : i32
    %c0_i32_0 = arith.constant 0 : i32
    %c0_i32_1 = arith.constant 0 : i32
    return %c0_i32, %c0_i32_0 : i32, i32
  }
  func.func @transform_5(%arg0: i32) -> (i32, i32) {
    %c0_i32 = arith.constant 0 : i32
    %c0_i32_0 = arith.constant 0 : i32
    %c0_i32_1 = arith.constant 0 : i32
    return %c0_i32, %c0_i32_0 : i32, i32
  }
  func.func @transform_6(%arg0: i32) -> (i32, i32) {
    %c0_i32 = arith.constant 0 : i32
    %c0_i32_0 = arith.constant 0 : i32
    return %arg0, %c0_i32 : i32, i32
  }
}

</mosaic_0001>

<bundles_post_ra>
// kernel: tpu_custom_call.1
= control target key start
LH: loop header
LB: loop body
LE: loop exit
PB: predicated region body
PF: predicated region fallthrough
CT: control target
= control target key end

     0   :  { %11 = vsyncpa [#allocation3], 0  ;;  %s453_s0 = inlined_call_operand.hbm [shape: f32[16,128], index: 0, kind: input, shape index: {}]   ;;  %s454_s1 = inlined_call_operand.hbm [shape: f32[16,128], index: 1, kind: input, shape index: {}]   ;;  %s455_s2 = inlined_call_operand.hbm [shape: f32[128,128], index: 2, kind: input, shape index: {}]   ;;  %s456_s3 = inlined_call_operand.vmem [shape: f32[1,128], index: 3, kind: input, shape index: {}]   ;;  %s457_s4 = inlined_call_operand.hbm [shape: f32[128,128], index: 4, kind: input, shape index: {}]   ;;  %s458_s5 = inlined_call_operand.vmem [shape: f32[1,128], index: 5, kind: input, shape index: {}]   ;;  %s459_s6 = inlined_call_operand.hbm [shape: f32[16,128], index: 6, kind: output, shape index: {}]  }
   0x1   :  { %12 = vsyncpa [#allocation6], 0 }
   0x2   :  { %13 = vsyncpa [#allocation9], 0 }
   0x3   :  { %14 = vsyncpa [#allocation4], 0  ;;  %s32_s23 = sshll.u32 %s454_s1, 4  ;;  %s375_s24 = smov [#allocation5]   ;;  %s33_s23 = int_to_ptr.hbm [resolvable:$true] %s32_s23 }
   0x4   :  { %s34_s25 = sshll.u32 %s375_s24, 4  ;;  %s19_s28 = sshll.u32 %s453_s0, 4  ;;  %s35_s25 = int_to_ptr.vmem [resolvable:$true] %s34_s25  ;;  %s20_s28 = int_to_ptr.hbm [resolvable:$true] %s19_s28 }
   0x5   :  { %s376_s29 = smov 128   ;;  %s377_s30 = smov 8  }
   0x6   :  { %40 = dma.hbm_to_vmem [thread:$0]  %s33_s23, 256, %s35_s25, [#allocation6], %s376_s29, %s376_s29, %s377_s30  }
   0x7   :  { %s378_s7 = smov [#allocation2]   ;;  %s45_s1 = sshll.u32 %s455_s2, 4  ;;  %s46_s1 = int_to_ptr.hbm [resolvable:$true] %s45_s1 }
   0x8   :  { %s21_s8 = sshll.u32 %s378_s7, 4  ;;  %s60_s12 = sshll.u32 %s457_s4, 4  ;;  %s22_s8 = int_to_ptr.vmem [resolvable:$true] %s21_s8  ;;  %s61_s12 = int_to_ptr.hbm [resolvable:$true] %s60_s12 }
   0x9   :  { %27 = dma.hbm_to_vmem [thread:$0]  %s20_s28, 256, %s22_s8, [#allocation3], %s376_s29, %s376_s29, %s377_s30  }
   0xa   :  { %s379_s13 = smov [#allocation7]   ;;  %s380_s15 = smov [#allocation8]  }
   0xb   :  { %s47_s14 = sshll.u32 %s379_s13, 4  ;;  %s62_s2 = sshll.u32 %s380_s15, 4  ;;  %s48_s14 = int_to_ptr.vmem [resolvable:$true] %s47_s14  ;;  %s63_s2 = int_to_ptr.vmem [resolvable:$true] %s62_s2 }
   0xc   :  { %53 = dma.hbm_to_vmem [thread:$0]  %s46_s1, 2048, %s48_s14, [#allocation6], %s376_s29, %s376_s29, %s377_s30  }
   0xd   :  { %68 = dma.hbm_to_vmem [thread:$0]  %s61_s12, 2048, %s63_s2, [#allocation9], %s376_s29, %s376_s29, %s377_s30  }
   0xe   :  { %367 = dma.done.wait [#allocation3], 256  }
   0xf   :  { %368 = vsyncadd [#allocation3], 4294967040 }
  0x10   :  { %369 = dma.done.wait [#allocation6], 2304  }
  0x11   :  { %370 = vsyncadd [#allocation6], 4294964992 }
  0x12   :  { %371 = dma.done.wait [#allocation9], 2048  }
  0x13   :  { %372 = vsyncadd [#allocation9], 4294965248  ;;  %v104_v0 = vld [vmem:[#allocation7 + $0x78] sm:$0xff]  ;;  %v103_v1 = vld [vmem:[#allocation7 + $0x70] sm:$0xff]  ;;  %s191_s22 = sshll.u32 %s459_s6, 4  ;;  %s192_s22 = int_to_ptr.hbm [resolvable:$true] %s191_s22 }
  0x14   :  { %206 = vmatpush.msra.mxu2 %v104_v0  ;;  %109 = vmatpush.msra.mxu0 %v104_v0  ;;  %v102_v2 = vld [vmem:[#allocation7 + $0x68] sm:$0xff]  ;;  %v101_v3 = vld [vmem:[#allocation7 + $0x60] sm:$0xff]  ;;  %v100_v4 = vld [vmem:[#allocation7 + $0x58] sm:$0xff] }
  0x15   :  { %v149_v5 = vld [vmem:[#allocation8 + $0x78] sm:$0xff]  ;;  %v148_v6 = vld [vmem:[#allocation8 + $0x70] sm:$0xff]  ;;  %v147_v8 = vld [vmem:[#allocation8 + $0x68] sm:$0xff] }
  0x16   :  { %207 = vmatpush.msra.mxu2 %v103_v1  ;;  %110 = vmatpush.msra.mxu0 %v103_v1  ;;  %v99_v7 = vld [vmem:[#allocation7 + $0x50] sm:$0xff]  ;;  %v98_v9 = vld [vmem:[#allocation7 + $0x48] sm:$0xff]  ;;  %v146_v10 = vld [vmem:[#allocation8 + $0x60] sm:$0xff] }
  0x17   :  { %222 = vmatpush.msra.mxu3 %v149_v5  ;;  %154 = vmatpush.msra.mxu1 %v149_v5  ;;  %v97_v11 = vld [vmem:[#allocation7 + $0x40] sm:$0xff]  ;;  %v145_v12 = vld [vmem:[#allocation8 + $0x58] sm:$0xff]  ;;  %v144_v14 = vld [vmem:[#allocation8 + $0x50] sm:$0xff] }
  0x18   :  { %208 = vmatpush.msra.mxu2 %v102_v2  ;;  %111 = vmatpush.msra.mxu0 %v102_v2  ;;  %v96_v13 = vld [vmem:[#allocation7 + $0x38] sm:$0xff]  ;;  %v95_v15 = vld [vmem:[#allocation7 + $0x30] sm:$0xff]  ;;  %v143_v16 = vld [vmem:[#allocation8 + $0x48] sm:$0xff] }
  0x19   :  { %223 = vmatpush.msra.mxu3 %v148_v6  ;;  %155 = vmatpush.msra.mxu1 %v148_v6  ;;  %v94_v17 = vld [vmem:[#allocation7 + $0x28] sm:$0xff]  ;;  %v142_v18 = vld [vmem:[#allocation8 + $0x40] sm:$0xff]  ;;  %v141_v20 = vld [vmem:[#allocation8 + $0x38] sm:$0xff] }
  0x1a   :  { %209 = vmatpush.msra.mxu2 %v101_v3  ;;  %112 = vmatpush.msra.mxu0 %v101_v3  ;;  %v93_v19 = vld [vmem:[#allocation7 + $0x20] sm:$0xff]  ;;  %v92_v21 = vld [vmem:[#allocation7 + $0x18] sm:$0xff]  ;;  %v140_v22 = vld [vmem:[#allocation8 + $0x30] sm:$0xff] }
  0x1b   :  { %224 = vmatpush.msra.mxu3 %v147_v8  ;;  %156 = vmatpush.msra.mxu1 %v147_v8  ;;  %v91_v23 = vld [vmem:[#allocation7 + $0x10] sm:$0xff]  ;;  %v139_v24 = vld [vmem:[#allocation8 + $0x28] sm:$0xff]  ;;  %v138_v26 = vld [vmem:[#allocation8 + $0x20] sm:$0xff] }
  0x1c   :  { %210 = vmatpush.msra.mxu2 %v100_v4  ;;  %113 = vmatpush.msra.mxu0 %v100_v4  ;;  %v90_v25 = vld [vmem:[#allocation7 + $0x8] sm:$0xff]  ;;  %v89_v27 = vld [vmem:[#allocation7] sm:$0xff]  ;;  %v137_v30 = vld [vmem:[#allocation8 + $0x18] sm:$0xff] }
  0x1d   :  { %225 = vmatpush.msra.mxu3 %v146_v10  ;;  %157 = vmatpush.msra.mxu1 %v146_v10  ;;  %v88_v28 = vld [vmem:[#allocation2 + $0x8] sm:$0xff]  ;;  %v87_v29 = vld [vmem:[#allocation2] sm:$0xff]  ;;  %v136_v31 = vld [vmem:[#allocation8 + $0x10] sm:$0xff] }
  0x1e   :  { %211 = vmatpush.msra.mxu2 %v99_v7  ;;  %114 = vmatpush.msra.mxu0 %v99_v7  ;;  %v135_v32 = vld [vmem:[#allocation8 + $0x8] sm:$0xff]  ;;  %v134_v33 = vld [vmem:[#allocation8] sm:$0xff]  ;;  %v177_v44 = vld [vmem:[#allocation5] sm:$0xff] }
  0x1f   :  { %226 = vmatpush.msra.mxu3 %v145_v12  ;;  %158 = vmatpush.msra.mxu1 %v145_v12  ;;  %v245_v34 = vld [vmem:[%s456_s3] ss:$0 sm:$0xff]  ;;  %v178_v49 = vld [vmem:[#allocation5 + $0x8] sm:$0xff]  ;;  %s381_s3 = smov [#allocation10]  }
  0x20   :  { %212 = vmatpush.msra.mxu2 %v98_v9  ;;  %115 = vmatpush.msra.mxu0 %v98_v9  ;;  %v246_v41 = vld [vmem:[%s458_s5] ss:$0 sm:$0xff]  ;;  %s189_s19 = sshll.u32 %s381_s3, 4  ;;  %s190_s19 = int_to_ptr.vmem [resolvable:$true] %s189_s19 }
  0x21   :  { %227 = vmatpush.msra.mxu3 %v144_v14  ;;  %159 = vmatpush.msra.mxu1 %v144_v14 }
  0x22   :  { %213 = vmatpush.msra.mxu2 %v97_v11  ;;  %116 = vmatpush.msra.mxu0 %v97_v11 }
  0x23   :  { %228 = vmatpush.msra.mxu3 %v143_v16  ;;  %160 = vmatpush.msra.mxu1 %v143_v16 }
  0x24   :  { %214 = vmatpush.msra.mxu2 %v96_v13  ;;  %117 = vmatpush.msra.mxu0 %v96_v13 }
  0x25   :  { %229 = vmatpush.msra.mxu3 %v142_v18  ;;  %161 = vmatpush.msra.mxu1 %v142_v18 }
  0x26   :  { %215 = vmatpush.msra.mxu2 %v95_v15  ;;  %118 = vmatpush.msra.mxu0 %v95_v15 }
  0x27   :  { %230 = vmatpush.msra.mxu3 %v141_v20  ;;  %162 = vmatpush.msra.mxu1 %v141_v20 }
  0x28   :  { %216 = vmatpush.msra.mxu2 %v94_v17  ;;  %119 = vmatpush.msra.mxu0 %v94_v17 }
  0x29   :  { %231 = vmatpush.msra.mxu3 %v140_v22  ;;  %163 = vmatpush.msra.mxu1 %v140_v22 }
  0x2a   :  { %217 = vmatpush.msra.mxu2 %v93_v19  ;;  %120 = vmatpush.msra.mxu0 %v93_v19 }
  0x2b   :  { %232 = vmatpush.msra.mxu3 %v139_v24  ;;  %164 = vmatpush.msra.mxu1 %v139_v24 }
  0x2c   :  { %218 = vmatpush.msra.mxu2 %v92_v21  ;;  %121 = vmatpush.msra.mxu0 %v92_v21 }
  0x2d   :  { %233 = vmatpush.msra.mxu3 %v138_v26  ;;  %165 = vmatpush.msra.mxu1 %v138_v26 }
  0x2e   :  { %219 = vmatpush.msra.mxu2 %v91_v23  ;;  %122 = vmatpush.msra.mxu0 %v91_v23 }
  0x2f   :  { %234 = vmatpush.msra.mxu3 %v137_v30  ;;  %166 = vmatpush.msra.mxu1 %v137_v30 }
  0x30   :  { %220 = vmatpush.msra.mxu2 %v90_v25  ;;  %123 = vmatpush.msra.mxu0 %v90_v25 }
  0x31   :  { %235 = vmatpush.msra.mxu3 %v136_v31  ;;  %167 = vmatpush.msra.mxu1 %v136_v31 }
  0x32   :  { %221 = vmatpush.msra.mxu2 %v89_v27  ;;  %124 = vmatpush.msra.mxu0 %v89_v27 }
  0x33   :  { %128 = vmatmul.f32.vlgmr.msra.gmra.mxu2 %v88_v28  ;;  %125 = vmatmul.f32.vlgmr.msra.gmra.mxu0 %v87_v29 }
  0x34   :  { %236 = vmatpush.msra.mxu3 %v135_v32  ;;  %168 = vmatpush.msra.mxu1 %v135_v32 }
  0x36   :  { %237 = vmatpush.msra.mxu3 %v134_v33  ;;  %169 = vmatpush.msra.mxu1 %v134_v33 }
  0xb0   :  { %v126_v35 = vpop.f32.mrf.mxu0 }
  0xb1   :  { %v127_v36 = vadd.f32 %v245_v34, %v126_v35 }
  0xb3   :  { %v132_v37 = vmax.f32 %v127_v36, 0.0 }
  0xb5   :  { %170 = vmatmul.f32.vlgmr.msra.gmra.mxu1 %v132_v37 }
  0xb6   :  { %v129_v38 = vpop.f32.mrf.mxu2 }
  0xb7   :  { %v130_v39 = vadd.f32 %v245_v34, %v129_v38 }
  0xb9   :  { %v133_v40 = vmax.f32 %v130_v39, 0.0 }
  0xbb   :  { %173 = vmatmul.f32.vlgmr.msra.gmra.mxu3 %v133_v40 }
 0x132   :  { %v171_v42 = vpop.f32.mrf.mxu1 }
 0x133   :  { %v172_v43 = vadd.f32 %v246_v41, %v171_v42 }
 0x135   :  { %v179_v45 = vmul.f32 0.1, %v172_v43 }
 0x137   :  { %v181_v46 = vadd.f32 %v179_v45, %v177_v44 }
 0x139   :  { %183 = vst [vmem:[#allocation10] sm:$0xff] %v181_v46 }
 0x13e   :  { %v174_v47 = vpop.f32.mrf.mxu3 }
 0x13f   :  { %v175_v48 = vadd.f32 %v246_v41, %v174_v47 }
 0x141   :  { %v180_v50 = vmul.f32 0.1, %v175_v48 }
 0x143   :  { %v182_v51 = vadd.f32 %v180_v50, %v178_v49 }
 0x145   :  { %184 = vst [vmem:[#allocation10 + $0x8] sm:$0xff] %v182_v51 }
 0x146   :  { %197 = dma.vmem_to_hbm [thread:$0]  %s190_s19, 256, %s192_s22, [#allocation4], %s376_s29, %s376_s29, %s377_s30  }
 0x147   :  { %373 = dma.done.wait [#allocation4], 256  }
 0x148   :  { %374 = vsyncadd [#allocation4], 4294967040 }
 0x149   :  { %202 = vsyncpa [#allocation3], 1 }
 0x14a   :  { %203 = vsyncpa [#allocation6], 1 }
 0x14b   :  { %204 = vsyncpa [#allocation9], 1 }
 0x14c   :  { %205 = vsyncpa [#allocation4], 1 }

</bundles_post_ra>
